<compile_context>
chip_gen: v7x
topology: tpu7x:2x2x1
jax: 0.10.0
libtpu: 0.0.40
codegen_flags: <defaults>
</compile_context>

<pallas_src>
import functools

import jax
import jax.numpy as jnp
from jax.experimental import pallas as pl
from jax.experimental.pallas import tpu as pltpu


def _round_up(x: int, m: int) -> int:
    return (x + m - 1) // m * m


def mlp_kernel(x_ref, w1_ref, b1_ref, w2_ref, b2_ref, w3_ref, b3_ref, o_ref):
    # Fused hot path: 3 MXU matmuls (bf16 operands, f32 accumulation) + bias adds
    # + 2 ReLUs (f32 on the VPU), all resident in VMEM for the batch tile.
    x = x_ref[...]                                                  # bf16 [bb, din_p]
    h = jnp.dot(x, w1_ref[...], preferred_element_type=jnp.float32) + b1_ref[...]
    h = jnp.maximum(h, 0.0).astype(jnp.bfloat16)                    # bf16 feed for MXU
    h = jnp.dot(h, w2_ref[...], preferred_element_type=jnp.float32) + b2_ref[...]
    h = jnp.maximum(h, 0.0).astype(jnp.bfloat16)
    out = jnp.dot(h, w3_ref[...], preferred_element_type=jnp.float32) + b3_ref[...]
    o_ref[...] = out.astype(o_ref.dtype)


@functools.partial(jax.jit, static_argnames=("block_b", "vmem_limit_mb"))
def mlp_forward(x, params, block_b=256, vmem_limit_mb=48):
    """x: [B, dim_in] float32. params: dict of w1,b1,w2,b2,w3,b3 (unpadded, f32)."""
    w1, b1, w2, b2, w3, b3 = (
        params["w1"], params["b1"], params["w2"],
        params["b2"], params["w3"], params["b3"],
    )
    B, dim_in = x.shape
    h1, h2, dim_out = w1.shape[1], w2.shape[1], w3.shape[1]
    out_dtype = x.dtype

    # --- lane-dense padding of every feature axis to a multiple of 128 -----------
    din_p, h1_p = _round_up(dim_in, 128), _round_up(h1, 128)
    h2_p, dout_p = _round_up(h2, 128), _round_up(dim_out, 128)

    # --- batch tile: big (MXU-friendly) but clipped for small B; keep >=2 steps ---
    bb = min(block_b, _round_up(B, 8))
    if _round_up(B, bb) // bb < 2 and bb > 8 and bb % 16 == 0:
        bb //= 2                      # give the grid 2 steps for 2-TC chips (v7x)
    B_pad = _round_up(B, bb)

    # --- pad + cast (bf16 operands halve HBM/VMEM weight traffic) -----------------
    def pad2(a, r, c):
        return jnp.pad(a, ((0, r - a.shape[0]), (0, c - a.shape[1])))

    x_p  = pad2(x,  B_pad, din_p).astype(jnp.bfloat16)
    w1_p = pad2(w1, din_p, h1_p).astype(jnp.bfloat16)
    w2_p = pad2(w2, h1_p,  h2_p).astype(jnp.bfloat16)
    w3_p = pad2(w3, h2_p,  dout_p).astype(jnp.bfloat16)
    b1_p = pad2(b1, 1, h1_p).astype(jnp.float32)
    b2_p = pad2(b2, 1, h2_p).astype(jnp.float32)
    b3_p = pad2(b3, 1, dout_p).astype(jnp.float32)

    grid = (B_pad // bb,)

    # Weights/biases are grid-invariant (index_map always (0,0)): Pallas only DMAs
    # them once. Feature axes are kept whole; they are full-extent and lane-dense.
    # TODO(synk): for very large hidden sizes (bf16 weights approaching the v7x
    # 64 MiB VMEM budget) add K/N tiling + pl.Buffered(1) on the weight specs.
    full = lambda shape: pl.BlockSpec(shape, lambda i: (0, 0))

    out_p = pl.pallas_call(
        mlp_kernel,
        out_shape=jax.ShapeDtypeStruct((B_pad, dout_p), out_dtype),
        grid_spec=pltpu.PrefetchScalarGridSpec(
            num_scalar_prefetch=0,
            grid=grid,
            in_specs=[
                pl.BlockSpec((bb, din_p), lambda i: (i, 0)),  # x tile
                full((din_p, h1_p)),   # w1
                full((1, h1_p)),       # b1
                full((h1_p, h2_p)),    # w2
                full((1, h2_p)),       # b2
                full((h2_p, dout_p)),  # w3
                full((1, dout_p)),     # b3
            ],
            out_specs=pl.BlockSpec((bb, dout_p), lambda i: (i, 0)),
        ),
        compiler_params=pltpu.CompilerParams(
            dimension_semantics=("parallel",),
            vmem_limit_bytes=vmem_limit_mb * 1024 * 1024,
        ),
    )(x_p, w1_p, b1_p, w2_p, b2_p, w3_p, b3_p)

    # Strip the row/column padding.
    return out_p[:B, :dim_out]


def init_mlp_params(key, dim_in, dim_out, expand_factor=2, dtype=jnp.float32):
    """Deterministic init mimicking PyTorch nn.Linear default:
    U(-1/sqrt(fan_in), 1/sqrt(fan_in)) for both weight and bias."""
    h1 = expand_factor * dim_in
    h2 = expand_factor * dim_out
    shapes = [
        ("w1", (dim_in, h1)), ("b1", (1, h1)),
        ("w2", (h1, h2)),     ("b2", (1, h2)),
        ("w3", (h2, dim_out)), ("b3", (1, dim_out)),
    ]
    fan_ins = {"w1": dim_in, "b1": dim_in, "w2": h1, "b2": h1,
               "w3": h2, "b3": h2}
    params = {}
    keys = jax.random.split(key, len(shapes))
    for (name, shape), k in zip(shapes, keys):
        bound = 1.0 / jnp.sqrt(jnp.array(fan_ins[name], dtype=jnp.float32))
        params[name] = jax.random.uniform(
            k, shape, dtype=dtype, minval=-bound, maxval=bound)
    return params


def mlp_reference(x, params):
    """Plain-JAX f32 reference for correctness checking."""
    h = jnp.maximum(x @ params["w1"] + params["b1"], 0.0)
    h = jnp.maximum(h @ params["w2"] + params["b2"], 0.0)
    return h @ params["w3"] + params["b3"]


if __name__ == "__main__":
    key = jax.random.PRNGKey(0)
    k_param, k_x = jax.random.split(key)

    # Small feature dims consistent with the module; enough rows to exercise the
    # 256-row batch tile and a 2-step ("parallel") grid.
    B, dim_in, dim_out = 512, 32, 16
    params = init_mlp_params(k_param, dim_in, dim_out, expand_factor=2)
    x = jax.random.normal(k_x, (B, dim_in), dtype=jnp.float32)

    out = mlp_forward(x, params, block_b=256)
    out = jax.block_until_ready(out)

    ref = mlp_reference(x, params)
    assert out.shape == (B, dim_out)
    # bf16 operands with f32 accumulation -> loose tolerance vs. f32 reference.
    assert jnp.allclose(out, ref, atol=5e-2, rtol=5e-2), (
        float(jnp.max(jnp.abs(out - ref))))

    print("KERNEL_OK")
</pallas_src>

<mosaic_0001>
module attributes {stable_mosaic.version = 11 : i64} {
  func.func @mlp_kernel(%arg0: i32, %arg1: memref<256x128xbf16, #tpu.memory_space<vmem>>, %arg2: memref<128x128xbf16, #tpu.memory_space<vmem>>, %arg3: memref<1x128xf32, #tpu.memory_space<vmem>>, %arg4: memref<128x128xbf16, #tpu.memory_space<vmem>>, %arg5: memref<1x128xf32, #tpu.memory_space<vmem>>, %arg6: memref<128x128xbf16, #tpu.memory_space<vmem>>, %arg7: memref<1x128xf32, #tpu.memory_space<vmem>>, %arg8: memref<256x128xf32, #tpu.memory_space<vmem>>) attributes {dimension_semantics = [#tpu.dimension_semantics<parallel>], iteration_bounds = array<i64: 2>, scalar_prefetch = 0 : i64, scratch_operands = 0 : i64, tpu.core_type = #tpu.core_type<tc>, window_params = [{transform_indices = @transform_0, window_bounds = array<i64: 256, 128>}, {pipeline_mode = #tpu.pipeline_mode<synchronous>, transform_indices = @transform_1, window_bounds = array<i64: 128, 128>}, {pipeline_mode = #tpu.pipeline_mode<synchronous>, transform_indices = @transform_2, window_bounds = array<i64: 1, 128>}, {pipeline_mode = #tpu.pipeline_mode<synchronous>, transform_indices = @transform_3, window_bounds = array<i64: 128, 128>}, {pipeline_mode = #tpu.pipeline_mode<synchronous>, transform_indices = @transform_4, window_bounds = array<i64: 1, 128>}, {pipeline_mode = #tpu.pipeline_mode<synchronous>, transform_indices = @transform_5, window_bounds = array<i64: 128, 128>}, {pipeline_mode = #tpu.pipeline_mode<synchronous>, transform_indices = @transform_6, window_bounds = array<i64: 1, 128>}, {transform_indices = @transform_7, window_bounds = array<i64: 256, 128>}]} {
    %c0 = arith.constant 0 : index
    %c0_0 = arith.constant 0 : index
    %0 = vector.load %arg1[%c0, %c0_0] : memref<256x128xbf16, #tpu.memory_space<vmem>>, vector<256x128xbf16>
    %c0_1 = arith.constant 0 : index
    %c0_2 = arith.constant 0 : index
    %1 = vector.load %arg2[%c0_1, %c0_2] : memref<128x128xbf16, #tpu.memory_space<vmem>>, vector<128x128xbf16>
    %cst = arith.constant dense<0.000000e+00> : vector<256x128xf32>
    %2 = tpu.matmul %0, %1, %cst {dimension_numbers = #tpu.dot_dimension_numbers<[1], [0], [0], [1], [0, 0, 1, 1], [], []>} : vector<256x128xbf16>, vector<128x128xbf16>, vector<256x128xf32> -> vector<256x128xf32>
    %c0_3 = arith.constant 0 : index
    %c0_4 = arith.constant 0 : index
    %3 = vector.load %arg3[%c0_3, %c0_4] : memref<1x128xf32, #tpu.memory_space<vmem>>, vector<1x128xf32>
    %4 = vector.broadcast %3 : vector<1x128xf32> to vector<256x128xf32>
    %5 = arith.addf %2, %4 : vector<256x128xf32>
    %cst_5 = arith.constant 0.000000e+00 : f32
    %6 = vector.broadcast %cst_5 : f32 to vector<256x128xf32>
    %7 = arith.maximumf %5, %6 : vector<256x128xf32>
    %8 = arith.truncf %7 : vector<256x128xf32> to vector<256x128xbf16>
    %c0_6 = arith.constant 0 : index
    %c0_7 = arith.constant 0 : index
    %9 = vector.load %arg4[%c0_6, %c0_7] : memref<128x128xbf16, #tpu.memory_space<vmem>>, vector<128x128xbf16>
    %cst_8 = arith.constant dense<0.000000e+00> : vector<256x128xf32>
    %10 = tpu.matmul %8, %9, %cst_8 {dimension_numbers = #tpu.dot_dimension_numbers<[1], [0], [0], [1], [0, 0, 1, 1], [], []>} : vector<256x128xbf16>, vector<128x128xbf16>, vector<256x128xf32> -> vector<256x128xf32>
    %c0_9 = arith.constant 0 : index
    %c0_10 = arith.constant 0 : index
    %11 = vector.load %arg5[%c0_9, %c0_10] : memref<1x128xf32, #tpu.memory_space<vmem>>, vector<1x128xf32>
    %12 = vector.broadcast %11 : vector<1x128xf32> to vector<256x128xf32>
    %13 = arith.addf %10, %12 : vector<256x128xf32>
    %cst_11 = arith.constant 0.000000e+00 : f32
    %14 = vector.broadcast %cst_11 : f32 to vector<256x128xf32>
    %15 = arith.maximumf %13, %14 : vector<256x128xf32>
    %16 = arith.truncf %15 : vector<256x128xf32> to vector<256x128xbf16>
    %c0_12 = arith.constant 0 : index
    %c0_13 = arith.constant 0 : index
    %17 = vector.load %arg6[%c0_12, %c0_13] : memref<128x128xbf16, #tpu.memory_space<vmem>>, vector<128x128xbf16>
    %cst_14 = arith.constant dense<0.000000e+00> : vector<256x128xf32>
    %18 = tpu.matmul %16, %17, %cst_14 {dimension_numbers = #tpu.dot_dimension_numbers<[1], [0], [0], [1], [0, 0, 1, 1], [], []>} : vector<256x128xbf16>, vector<128x128xbf16>, vector<256x128xf32> -> vector<256x128xf32>
    %c0_15 = arith.constant 0 : index
    %c0_16 = arith.constant 0 : index
    %19 = vector.load %arg7[%c0_15, %c0_16] : memref<1x128xf32, #tpu.memory_space<vmem>>, vector<1x128xf32>
    %20 = vector.broadcast %19 : vector<1x128xf32> to vector<256x128xf32>
    %21 = arith.addf %18, %20 : vector<256x128xf32>
    %c0_17 = arith.constant 0 : index
    %c0_18 = arith.constant 0 : index
    %22 = vector.load %arg8[%c0_17, %c0_18] : memref<256x128xf32, #tpu.memory_space<vmem>>, vector<256x128xf32>
    tpu.vector_store %arg8[%c0_17, %c0_18], %21 {strides = array<i32>} : memref<256x128xf32, #tpu.memory_space<vmem>>, vector<256x128xf32>,
    return
  }
  func.func @transform_0(%arg0: i32) -> (i32, i32) {
    %c0_i32 = arith.constant 0 : i32
    %c0_i32_0 = arith.constant 0 : i32
    return %arg0, %c0_i32 : i32, i32
  }
  func.func @transform_1(%arg0: i32) -> (i32, i32) {
    %c0_i32 = arith.constant 0 : i32
    %c0_i32_0 = arith.constant 0 : i32
    %c0_i32_1 = arith.constant 0 : i32
    return %c0_i32, %c0_i32_0 : i32, i32
  }
  func.func @transform_2(%arg0: i32) -> (i32, i32) {
    %c0_i32 = arith.constant 0 : i32
    %c0_i32_0 = arith.constant 0 : i32
    %c0_i32_1 = arith.constant 0 : i32
    return %c0_i32, %c0_i32_0 : i32, i32
  }
  func.func @transform_3(%arg0: i32) -> (i32, i32) {
    %c0_i32 = arith.constant 0 : i32
    %c0_i32_0 = arith.constant 0 : i32
    %c0_i32_1 = arith.constant 0 : i32
    return %c0_i32, %c0_i32_0 : i32, i32
  }
  func.func @transform_4(%arg0: i32) -> (i32, i32) {
    %c0_i32 = arith.constant 0 : i32
    %c0_i32_0 = arith.constant 0 : i32
    %c0_i32_1 = arith.constant 0 : i32
    return %c0_i32, %c0_i32_0 : i32, i32
  }
  func.func @transform_5(%arg0: i32) -> (i32, i32) {
    %c0_i32 = arith.constant 0 : i32
    %c0_i32_0 = arith.constant 0 : i32
    %c0_i32_1 = arith.constant 0 : i32
    return %c0_i32, %c0_i32_0 : i32, i32
  }
  func.func @transform_6(%arg0: i32) -> (i32, i32) {
    %c0_i32 = arith.constant 0 : i32
    %c0_i32_0 = arith.constant 0 : i32
    %c0_i32_1 = arith.constant 0 : i32
    return %c0_i32, %c0_i32_0 : i32, i32
  }
  func.func @transform_7(%arg0: i32) -> (i32, i32) {
    %c0_i32 = arith.constant 0 : i32
    %c0_i32_0 = arith.constant 0 : i32
    return %arg0, %c0_i32 : i32, i32
  }
}

</mosaic_0001>

<bundles_post_ra>
// kernel: mlp_forward.1
= control target key start
LH: loop header
LB: loop body
LE: loop exit
PB: predicated region body
PF: predicated region fallthrough
CT: control target
= control target key end

     0   :  { %s1673_s24 = smov 0   ;;  %s1941_s0 = inlined_call_operand.vmem [shape: bf16[512,128], index: 0, kind: input, shape index: {}]   ;;  %s1942_s1 = inlined_call_operand.vmem [shape: bf16[128,128], index: 1, kind: input, shape index: {}]   ;;  %s1943_s2 = inlined_call_operand.vmem [shape: f32[1,128], index: 2, kind: input, shape index: {}]   ;;  %s1944_s3 = inlined_call_operand.vmem [shape: bf16[128,128], index: 3, kind: input, shape index: {}]   ;;  %s1945_s4 = inlined_call_operand.vmem [shape: f32[1,128], index: 4, kind: input, shape index: {}]   ;;  %s1946_s5 = inlined_call_operand.vmem [shape: bf16[128,128], index: 5, kind: input, shape index: {}]   ;;  %s1947_s6 = inlined_call_operand.vmem [shape: f32[1,128], index: 6, kind: input, shape index: {}]   ;;  %s1948_s7 = inlined_call_operand.vmem [shape: f32[512,128], index: 7, kind: output, shape index: {}]  }
   0x1 LB: > { %s1291_s25 = sadd.s32 4294967295, %s1631_s24   ;;  %p1295_p0 = scmp.ge.s32.totalorder %s1631_s24, 1  ;;  %s1631_s24 = sphi %s1673_s24, %s17_s24  }
   0x2   : > { %p238_p1 = scmp.lt.s32.totalorder %s1631_s24, 3 }
   0x4   : > { %p239_p2 = pnand %p1295_p0, %p238_p1 }
   0x5   : > { %v1585_v0 = vld [vmem:[%s1942_s1] sm:$0xff] (!%p239_p2)   ;;  %s1296_s28 = sshll.u32 (!%p239_p2), %s1291_s25, 5  ;;  %v1586_v1 = vld [vmem:[%s1942_s1 + $0x8] sm:$0xff] (!%p239_p2)   ;;  %v1587_v2 = vld [vmem:[%s1942_s1 + $0x10] sm:$0xff] (!%p239_p2)  }
   0x6   : > { %242 = sbr.rel (%p239_p2) target bundleno = 756 (0x2f4), region = 48  ;;  %p271_p3 = scmp.lt.s32.totalorder (!%p239_p2), %s1296_s28, 63  ;;  %1417 = vmatprep.subr.bf16.mxu0 (!%p239_p2), %v1585_v0  ;;  %1561 = vmatprep.subr.bf16.mxu1 (!%p239_p2), %v1585_v0  ;;  %v1588_v3 = vld [vmem:[%s1942_s1 + $0x18] sm:$0xff] (!%p239_p2)   ;;  %v1589_v5 = vld [vmem:[%s1942_s1 + $0x20] sm:$0xff] (!%p239_p2)   ;;  %v1590_v6 = vld [vmem:[%s1942_s1 + $0x28] sm:$0xff] (!%p239_p2)  }
   0x7   : > { %1418 = vmatpush3.bf16.msra.mxu0 (!%p239_p2), %v1585_v0  ;;  %1569 = vmatpush3.bf16.msra.mxu1 (!%p239_p2), %v1585_v0  ;;  %v1591_v8 = vld [vmem:[%s1942_s1 + $0x30] sm:$0xff] (!%p239_p2)   ;;  %v1592_v9 = vld [vmem:[%s1942_s1 + $0x38] sm:$0xff] (!%p239_p2)   ;;  %v1609_v12 = vld [vmem:[%s1944_s3] sm:$0xff] (!%p239_p2)  }
   0x8   : > { %1419 = vmatprep.subr.bf16.mxu0 (!%p239_p2), %v1586_v1  ;;  %1562 = vmatprep.subr.bf16.mxu1 (!%p239_p2), %v1586_v1  ;;  %v1610_v15 = vld [vmem:[%s1944_s3 + $0x8] sm:$0xff] (!%p239_p2)   ;;  %v1611_v16 = vld [vmem:[%s1944_s3 + $0x10] sm:$0xff] (!%p239_p2)   ;;  %v1612_v21 = vld [vmem:[%s1944_s3 + $0x18] sm:$0xff] (!%p239_p2)  }
   0x9   : > { %v1613_v22 = vld [vmem:[%s1944_s3 + $0x20] sm:$0xff] (!%p239_p2)   ;;  %v1614_v27 = vld [vmem:[%s1944_s3 + $0x28] sm:$0xff] (!%p239_p2)   ;;  %v1615_v30 = vld [vmem:[%s1944_s3 + $0x30] sm:$0xff] (!%p239_p2)  }
   0xa   : > { %v1616_v31 = vld [vmem:[%s1944_s3 + $0x38] sm:$0xff] (!%p239_p2)   ;;  %v1617_v32 = vld [vmem:[%s1946_s5] sm:$0xff] (!%p239_p2)   ;;  %v1618_v33 = vld [vmem:[%s1946_s5 + $0x8] sm:$0xff] (!%p239_p2)  }
   0xb   : > { %1420 = vmatpush3.bf16.msra.mxu0 (!%p239_p2), %v1586_v1  ;;  %1570 = vmatpush3.bf16.msra.mxu1 (!%p239_p2), %v1586_v1  ;;  %v1619_v34 = vld [vmem:[%s1946_s5 + $0x10] sm:$0xff] (!%p239_p2)   ;;  %v1620_v35 = vld [vmem:[%s1946_s5 + $0x18] sm:$0xff] (!%p239_p2)   ;;  %v1621_v36 = vld [vmem:[%s1946_s5 + $0x20] sm:$0xff] (!%p239_p2)  }
   0xc   : > { %1421 = vmatprep.subr.bf16.mxu0 (!%p239_p2), %v1587_v2  ;;  %1563 = vmatprep.subr.bf16.mxu1 (!%p239_p2), %v1587_v2  ;;  %v1622_v37 = vld [vmem:[%s1946_s5 + $0x28] sm:$0xff] (!%p239_p2)   ;;  %v1774_v38 = vld [vmem:[%s1943_s2] ss:$0 sm:$0xff] (!%p239_p2) }
   0xd   : > { %s1950_s28 = smov (!%p271_p3, %s1296_s28), 63 }
   0xe   : > { %s1297_s10 = sshll.u32 %s1950_s28, 2  ;;  %s1299_s19 = sshll.u32 %s1950_s28, 3 }
   0xf   : > { %s1696_s13 = scalar_lea.vmem %s1941_s0, %s1297_s10  ;;  %1422 = vmatpush3.bf16.msra.mxu0 %v1587_v2  ;;  %1571 = vmatpush3.bf16.msra.mxu1 %v1587_v2  ;;  %s1872_s23 = scalar_lea.vmem %s1948_s7, %s1299_s19 }
  0x10   : > { %v1593_v4 = vld [vmem:[%s1696_s13] sm:$0xff]   ;;  %1423 = vmatprep.subr.bf16.mxu0 %v1588_v3  ;;  %1564 = vmatprep.subr.bf16.mxu1 %v1588_v3  ;;  %v1594_v10 = vld [vmem:[%s1696_s13 + $0x8] sm:$0xff]   ;;  %v1595_v13 = vld [vmem:[%s1696_s13 + $0x10] sm:$0xff]  }
  0x11   : > { %1433 = vmatprep.mubr.bf16.mxu0 %v1593_v4  ;;  %v1601_v7 = vld [vmem:[%s1696_s13 + $0x40] sm:$0xff]   ;;  %v1602_v11 = vld [vmem:[%s1696_s13 + $0x48] sm:$0xff]   ;;  %v1603_v14 = vld [vmem:[%s1696_s13 + $0x50] sm:$0xff]  }
  0x12   : > { %1449 = vmatprep.mubr.bf16.mxu1 %v1601_v7  ;;  %v1596_v17 = vld [vmem:[%s1696_s13 + $0x18] sm:$0xff]   ;;  %v1597_v19 = vld [vmem:[%s1696_s13 + $0x20] sm:$0xff]   ;;  %v1598_v23 = vld [vmem:[%s1696_s13 + $0x28] sm:$0xff]  }
  0x13   : > { %1424 = vmatpush3.bf16.msra.mxu0 %v1588_v3  ;;  %1572 = vmatpush3.bf16.msra.mxu1 %v1588_v3  ;;  %v1604_v18 = vld [vmem:[%s1696_s13 + $0x58] sm:$0xff]   ;;  %v1605_v20 = vld [vmem:[%s1696_s13 + $0x60] sm:$0xff]   ;;  %v1606_v24 = vld [vmem:[%s1696_s13 + $0x68] sm:$0xff]  }
  0x14   : > { %1425 = vmatprep.subr.bf16.mxu0 %v1589_v5  ;;  %1565 = vmatprep.subr.bf16.mxu1 %v1589_v5  ;;  %v1599_v25 = vld [vmem:[%s1696_s13 + $0x30] sm:$0xff]   ;;  %v1600_v28 = vld [vmem:[%s1696_s13 + $0x38] sm:$0xff]  }
  0x15   : > { %v1607_v26 = vld [vmem:[%s1696_s13 + $0x70] sm:$0xff]   ;;  %v1608_v29 = vld [vmem:[%s1696_s13 + $0x78] sm:$0xff]  }
  0x17   : > { %1426 = vmatpush3.bf16.msra.mxu0 %v1589_v5  ;;  %1573 = vmatpush3.bf16.msra.mxu1 %v1589_v5 }
  0x18   : > { %1427 = vmatprep.subr.bf16.mxu0 %v1590_v6  ;;  %1566 = vmatprep.subr.bf16.mxu1 %v1590_v6 }
  0x1b   : > { %1428 = vmatpush3.bf16.msra.mxu0 %v1590_v6  ;;  %1574 = vmatpush3.bf16.msra.mxu1 %v1590_v6 }
  0x1c   : > { %1429 = vmatprep.subr.bf16.mxu0 %v1591_v8  ;;  %1567 = vmatprep.subr.bf16.mxu1 %v1591_v8 }
  0x1f   : > { %1430 = vmatpush3.bf16.msra.mxu0 %v1591_v8  ;;  %1575 = vmatpush3.bf16.msra.mxu1 %v1591_v8 }
  0x20   : > { %1431 = vmatprep.subr.bf16.mxu0 %v1592_v9  ;;  %1568 = vmatprep.subr.bf16.mxu1 %v1592_v9 }
  0x23   : > { %1432 = vmatpush3.bf16.msra.mxu0 %v1592_v9  ;;  %1576 = vmatpush3.bf16.msra.mxu1 %v1592_v9 }
  0x24   : > { %1465 = vmatprep.subr.bf16.mxu1 %v1609_v12  ;;  %1513 = vmatprep.subr.bf16.mxu0 %v1617_v32 }
  0x26   : > { %1434 = vmatmul.mubr.bf16.vlgmr.msra.gmra.mrb[0].mxu0 %v1594_v10  ;;  %1450 = vmatmul.mubr.bf16.vlgmr.msra.gmra.mrb[0].mxu1 %v1602_v11 }
  0x27   : > { %1437 = vmatprep.mubr.bf16.mxu0 %v1595_v13  ;;  %1453 = vmatprep.mubr.bf16.mxu1 %v1603_v14 }
  0x28   : > { %1466 = vmatpush3.bf16.msra.mxu1 %v1609_v12  ;;  %1514 = vmatpush3.bf16.msra.mxu0 %v1617_v32 }
  0x29   : > { %1467 = vmatprep.subr.bf16.mxu1 %v1610_v15  ;;  %1515 = vmatprep.subr.bf16.mxu0 %v1618_v33 }
  0x2c   : > { %1468 = vmatpush3.bf16.msra.mxu1 %v1610_v15  ;;  %1516 = vmatpush3.bf16.msra.mxu0 %v1618_v33 }
  0x2d   : > { %1469 = vmatprep.subr.bf16.mxu1 %v1611_v16  ;;  %1517 = vmatprep.subr.bf16.mxu0 %v1619_v34 }
  0x2e   : > { %1438 = vmatmul.mubr.bf16.gmra.mrb[4].mxu0 %v1596_v17  ;;  %1454 = vmatmul.mubr.bf16.gmra.mrb[4].mxu1 %v1604_v18 }
  0x2f   : > { %1441 = vmatprep.mubr.bf16.mxu0 %v1597_v19  ;;  %1457 = vmatprep.mubr.bf16.mxu1 %v1605_v20 }
  0x30   : > { %1470 = vmatpush3.bf16.msra.mxu1 %v1611_v16  ;;  %1518 = vmatpush3.bf16.msra.mxu0 %v1619_v34 }
  0x31   : > { %1471 = vmatprep.subr.bf16.mxu1 %v1612_v21  ;;  %1519 = vmatprep.subr.bf16.mxu0 %v1620_v35 }
  0x34   : > { %1472 = vmatpush3.bf16.msra.mxu1 %v1612_v21  ;;  %1520 = vmatpush3.bf16.msra.mxu0 %v1620_v35 }
  0x35   : > { %1473 = vmatprep.subr.bf16.mxu1 %v1613_v22  ;;  %1521 = vmatprep.subr.bf16.mxu0 %v1621_v36 }
  0x36   : > { %1442 = vmatmul.mubr.bf16.gmra.mrb[8].mxu0 %v1598_v23  ;;  %1458 = vmatmul.mubr.bf16.gmra.mrb[8].mxu1 %v1606_v24 }
  0x37   : > { %1445 = vmatprep.mubr.bf16.mxu0 %v1599_v25  ;;  %1461 = vmatprep.mubr.bf16.mxu1 %v1607_v26 }
  0x38   : > { %1474 = vmatpush3.bf16.msra.mxu1 %v1613_v22  ;;  %1522 = vmatpush3.bf16.msra.mxu0 %v1621_v36 }
  0x39   : > { %1475 = vmatprep.subr.bf16.mxu1 %v1614_v27  ;;  %1523 = vmatprep.subr.bf16.mxu0 %v1622_v37 }
  0x3c   : > { %1476 = vmatpush3.bf16.msra.mxu1 %v1614_v27  ;;  %1524 = vmatpush3.bf16.msra.mxu0 %v1622_v37 }
  0x3d   : > { %1477 = vmatprep.subr.bf16.mxu1 %v1615_v30 }
  0x3e   : > { %1446 = vmatmul.mubr.bf16.gmra.mrb[12].mxu0 %v1600_v28  ;;  %1462 = vmatmul.mubr.bf16.gmra.mrb[12].mxu1 %v1608_v29 }
  0x40   : > { %1478 = vmatpush3.bf16.msra.mxu1 %v1615_v30 }
  0x41   : > { %1479 = vmatprep.subr.bf16.mxu1 %v1616_v31 }
  0x44   : > { %1480 = vmatpush3.bf16.msra.mxu1 %v1616_v31 }
  0xf9   : > { %v1435_v39 = vpop.f32.mrb[0].mxu0  ;;  %v1451_v40 = vpop.f32.mrb[0].mxu1 }
  0xfa   : > { %v525_v41 = vadd.f32 %v1435_v39, %v1774_v38  ;;  %v516_v42 = vpop.f32.mrb[1].mxu0  ;;  %v589_v43 = vadd.f32 %v1451_v40, %v1774_v38  ;;  %v580_v44 = vpop.f32.mrb[1].mxu1 }
  0xfb   : > { %v517_v45 = vadd.f32 %v1774_v38, %v516_v42  ;;  %v1436_v46 = vpop.f32.mrb[2].mxu0  ;;  %v581_v47 = vadd.f32 %v1774_v38, %v580_v44  ;;  %v1452_v48 = vpop.f32.mrb[2].mxu1 }
  0xfc   : > { %v528_v49 = vadd.f32 %v1436_v46, %v1774_v38  ;;  %v519_v50 = vpop.f32.mrb[3].mxu0  ;;  %v661_v51 = vmax.f32 %v589_v43, 0.0  ;;  %v592_v52 = vadd.f32 %v1452_v48, %v1774_v38  ;;  %v583_v53 = vpop.f32.mrb[3].mxu1  ;;  %v645_v57 = vmax.f32 %v525_v41, 0.0 }
  0xfd   : > { %v520_v54 = vadd.f32 %v1774_v38, %v519_v50  ;;  %v659_v55 = vmax.f32 %v581_v47, 0.0  ;;  %v584_v56 = vadd.f32 %v1774_v38, %v583_v53  ;;  %v643_v60 = vmax.f32 %v517_v45, 0.0 }
  0xfe   : > { %v646_v58 = vmax.f32 %v528_v49, 0.0  ;;  %v662_v59 = vmax.f32 %v592_v52, 0.0 }
  0xff   : > { %v644_v61 = vmax.f32 %v520_v54, 0.0  ;;  %v660_v62 = vmax.f32 %v584_v56, 0.0 }
 0x100   : > { %v676_v63 = vpack.c.bf16 %v646_v58, %v645_v57  ;;  %v1784_v0 = vpack.c.bf16 %v662_v59, %v661_v51 }
 0x101   : > { %v675_v1 = vpack.c.bf16 %v644_v61, %v643_v60  ;;  %v1439_v2 = vpop.f32.mrb[4].mxu0  ;;  %v1786_v3 = vpack.c.bf16 %v660_v62, %v659_v55  ;;  %v1455_v4 = vpop.f32.mrb[4].mxu1 }
 0x102   : > { %v541_v5 = vadd.f32 %v1439_v2, %v1774_v38  ;;  %v532_v6 = vpop.f32.mrb[5].mxu0  ;;  %v605_v7 = vadd.f32 %v1455_v4, %v1774_v38  ;;  %v596_v8 = vpop.f32.mrb[5].mxu1 }
 0x103   : > { %v533_v9 = vadd.f32 %v1774_v38, %v532_v6  ;;  %v1440_v10 = vpop.f32.mrb[6].mxu0  ;;  %1481 = vmatprep.mubr.bf16.mxu1 %v675_v1  ;;  %v597_v11 = vadd.f32 %v1774_v38, %v596_v8  ;;  %v1456_v12 = vpop.f32.mrb[6].mxu1 }
 0x104   : > { %v544_v13 = vadd.f32 %v1440_v10, %v1774_v38  ;;  %v535_v14 = vpop.f32.mrb[7].mxu0  ;;  %1482 = vmatmul.mubr.bf16.vlgmr.msra.gmra.mrb[16].mxu1 %v676_v63  ;;  %v665_v15 = vmax.f32 %v605_v7, 0.0  ;;  %v608_v16 = vadd.f32 %v1456_v12, %v1774_v38  ;;  %v599_v17 = vpop.f32.mrb[7].mxu1  ;;  %v649_v21 = vmax.f32 %v541_v5, 0.0 }
 0x105   : > { %v536_v18 = vadd.f32 %v1774_v38, %v535_v14  ;;  %v663_v19 = vmax.f32 %v597_v11, 0.0  ;;  %v600_v20 = vadd.f32 %v1774_v38, %v599_v17  ;;  %v647_v24 = vmax.f32 %v533_v9, 0.0 }
 0x106   : > { %v650_v22 = vmax.f32 %v544_v13, 0.0  ;;  %v666_v23 = vmax.f32 %v608_v16, 0.0 }
 0x107   : > { %v648_v25 = vmax.f32 %v536_v18, 0.0  ;;  %v664_v26 = vmax.f32 %v600_v20, 0.0 }
 0x108   : > { %v678_v27 = vpack.c.bf16 %v650_v22, %v649_v21  ;;  %v1796_v28 = vpack.c.bf16 %v666_v23, %v665_v15 }
 0x109   : > { %v677_v29 = vpack.c.bf16 %v648_v25, %v647_v24  ;;  %v1443_v30 = vpop.f32.mrb[8].mxu0  ;;  %v1798_v31 = vpack.c.bf16 %v664_v26, %v663_v19  ;;  %v1459_v32 = vpop.f32.mrb[8].mxu1 }
 0x10a   : > { %v557_v33 = vadd.f32 %v1443_v30, %v1774_v38  ;;  %v548_v34 = vpop.f32.mrb[9].mxu0  ;;  %v621_v35 = vadd.f32 %v1459_v32, %v1774_v38  ;;  %v612_v36 = vpop.f32.mrb[9].mxu1 }
 0x10b   : > { %v549_v37 = vadd.f32 %v1774_v38, %v548_v34  ;;  %v1444_v39 = vpop.f32.mrb[10].mxu0  ;;  %1485 = vmatprep.mubr.bf16.mxu1 %v677_v29  ;;  %v613_v40 = vadd.f32 %v1774_v38, %v612_v36  ;;  %v1460_v41 = vpop.f32.mrb[10].mxu1 }
 0x10c   : > { %v560_v42 = vadd.f32 %v1444_v39, %v1774_v38  ;;  %v551_v43 = vpop.f32.mrb[11].mxu0  ;;  %1486 = vmatmul.mubr.bf16.gmra.mrb[20].mxu1 %v678_v27  ;;  %v669_v44 = vmax.f32 %v621_v35, 0.0  ;;  %v624_v45 = vadd.f32 %v1460_v41, %v1774_v38  ;;  %v615_v46 = vpop.f32.mrb[11].mxu1  ;;  %v653_v50 = vmax.f32 %v557_v33, 0.0 }
 0x10d   : > { %v552_v47 = vadd.f32 %v1774_v38, %v551_v43  ;;  %v667_v48 = vmax.f32 %v613_v40, 0.0  ;;  %v616_v49 = vadd.f32 %v1774_v38, %v615_v46  ;;  %v651_v53 = vmax.f32 %v549_v37, 0.0 }
 0x10e   : > { %v654_v51 = vmax.f32 %v560_v42, 0.0  ;;  %v670_v52 = vmax.f32 %v624_v45, 0.0 }
 0x10f   : > { %v652_v54 = vmax.f32 %v552_v47, 0.0  ;;  %v668_v55 = vmax.f32 %v616_v49, 0.0 }
 0x110   : > { %v680_v56 = vpack.c.bf16 %v654_v51, %v653_v50  ;;  %v688_v57 = vpack.c.bf16 %v670_v52, %v669_v44 }
 0x111   : > { %v679_v58 = vpack.c.bf16 %v652_v54, %v651_v53  ;;  %v1447_v59 = vpop.f32.mrb[12].mxu0  ;;  %v687_v60 = vpack.c.bf16 %v668_v55, %v667_v48  ;;  %v1463_v61 = vpop.f32.mrb[12].mxu1 }
 0x112   : > { %v573_v62 = vadd.f32 %v1447_v59, %v1774_v38  ;;  %v564_v63 = vpop.f32.mrb[13].mxu0  ;;  %v637_v1 = vadd.f32 %v1463_v61, %v1774_v38  ;;  %v628_v2 = vpop.f32.mrb[13].mxu1 }
 0x113   : > { %v565_v4 = vadd.f32 %v1774_v38, %v564_v63  ;;  %v1448_v5 = vpop.f32.mrb[14].mxu0  ;;  %1489 = vmatprep.mubr.bf16.mxu1 %v679_v58  ;;  %v629_v6 = vadd.f32 %v1774_v38, %v628_v2  ;;  %v1464_v7 = vpop.f32.mrb[14].mxu1 }
 0x114   : > { %v576_v8 = vadd.f32 %v1448_v5, %v1774_v38  ;;  %v567_v9 = vpop.f32.mrb[15].mxu0  ;;  %1490 = vmatmul.mubr.bf16.gmra.mrb[24].mxu1 %v680_v56  ;;  %v673_v10 = vmax.f32 %v637_v1, 0.0  ;;  %v640_v11 = vadd.f32 %v1464_v7, %v1774_v38  ;;  %v631_v12 = vpop.f32.mrb[15].mxu1  ;;  %v657_v16 = vmax.f32 %v573_v62, 0.0 }
 0x115   : > { %v568_v13 = vadd.f32 %v1774_v38, %v567_v9  ;;  %v671_v14 = vmax.f32 %v629_v6, 0.0  ;;  %v632_v15 = vadd.f32 %v1774_v38, %v631_v12  ;;  %v655_v19 = vmax.f32 %v565_v4, 0.0  ;;  %v1623_v38 = vld [vmem:[%s1946_s5 + $0x30] sm:$0xff]  }
 0x116   : > { %v658_v17 = vmax.f32 %v576_v8, 0.0  ;;  %v674_v18 = vmax.f32 %v640_v11, 0.0  ;;  %1525 = vmatprep.subr.bf16.mxu0 %v1623_v38 }
 0x117   : > { %v656_v20 = vmax.f32 %v568_v13, 0.0  ;;  %v672_v21 = vmax.f32 %v632_v15, 0.0  ;;  %1526 = vmatpush3.bf16.msra.mxu0 %v1623_v38 }
 0x118   : > { %v682_v22 = vpack.c.bf16 %v658_v17, %v657_v16  ;;  %v690_v23 = vpack.c.bf16 %v674_v18, %v673_v10 }
 0x119   : > { %v681_v24 = vpack.c.bf16 %v656_v20, %v655_v19  ;;  %v689_v25 = vpack.c.bf16 %v672_v21, %v671_v14 }
 0x11b   : > { %1493 = vmatprep.mubr.bf16.mxu1 %v681_v24 }
 0x11c   : > { %1494 = vmatmul.mubr.bf16.gmra.mrb[28].mxu1 %v682_v22 }
 0x11d   : > { %1497 = vmatprep.mubr.bf16.mxu1 %v1786_v3  ;;  %v1624_v3 = vld [vmem:[%s1946_s5 + $0x38] sm:$0xff]  }
 0x11e   : > { %1527 = vmatprep.subr.bf16.mxu0 %v1624_v3 }
 0x11f   : > { %1528 = vmatpush3.bf16.msra.mxu0 %v1624_v3 }
 0x124   : > { %1498 = vmatmul.mubr.bf16.gmra.mrb[32].mxu1 %v1784_v0  ;;  %v1829_v0 = vld [vmem:[%s1945_s4] ss:$0 sm:$0xff] }
 0x125   : > { %1501 = vmatprep.mubr.bf16.mxu1 %v1798_v31 }
 0x12c   : > { %1502 = vmatmul.mubr.bf16.gmra.mrb[36].mxu1 %v1796_v28 }
 0x12d   : > { %1505 = vmatprep.mubr.bf16.mxu1 %v687_v60 }
 0x134   : > { %1506 = vmatmul.mubr.bf16.gmra.mrb[40].mxu1 %v688_v57 }
 0x135   : > { %1509 = vmatprep.mubr.bf16.mxu1 %v689_v25 }
 0x13c   : > { %1510 = vmatmul.mubr.bf16.gmra.mrb[44].mxu1 %v690_v23 }
 0x1d7   : > { %v1483_v26 = vpop.f32.mrb[16].mxu1 }
 0x1d8   : > { %v805_v27 = vadd.f32 %v1483_v26, %v1829_v0  ;;  %v796_v28 = vpop.f32.mrb[17].mxu1 }
 0x1d9   : > { %v797_v29 = vadd.f32 %v1829_v0, %v796_v28  ;;  %v1484_v30 = vpop.f32.mrb[18].mxu1 }
 0x1da   : > { %v808_v31 = vadd.f32 %v1484_v30, %v1829_v0  ;;  %v799_v32 = vpop.f32.mrb[19].mxu1  ;;  %v925_v34 = vmax.f32 %v805_v27, 0.0 }
 0x1db   : > { %v800_v33 = vadd.f32 %v1829_v0, %v799_v32  ;;  %v923_v36 = vmax.f32 %v797_v29, 0.0 }
 0x1dc   : > { %v926_v35 = vmax.f32 %v808_v31, 0.0 }
 0x1dd   : > { %v924_v37 = vmax.f32 %v800_v33, 0.0 }
 0x1de   : > { %v956_v39 = vpack.c.bf16 %v926_v35, %v925_v34 }
 0x1df   : > { %v955_v40 = vpack.c.bf16 %v924_v37, %v923_v36  ;;  %v1487_v41 = vpop.f32.mrb[20].mxu1 }
 0x1e0   : > { %v821_v42 = vadd.f32 %v1487_v41, %v1829_v0  ;;  %v812_v43 = vpop.f32.mrb[21].mxu1 }
 0x1e1   : > { %v813_v44 = vadd.f32 %v1829_v0, %v812_v43  ;;  %v1488_v45 = vpop.f32.mrb[22].mxu1  ;;  %1529 = vmatprep.mubr.bf16.mxu0 %v955_v40 }
 0x1e2   : > { %v824_v46 = vadd.f32 %v1488_v45, %v1829_v0  ;;  %v815_v47 = vpop.f32.mrb[23].mxu1  ;;  %1530 = vmatmul.mubr.bf16.vlgmr.msra.gmra.mrb[16].mxu0 %v956_v39  ;;  %v929_v49 = vmax.f32 %v821_v42, 0.0 }
 0x1e3   : > { %v816_v48 = vadd.f32 %v1829_v0, %v815_v47  ;;  %v927_v51 = vmax.f32 %v813_v44, 0.0 }
 0x1e4   : > { %v930_v50 = vmax.f32 %v824_v46, 0.0 }
 0x1e5   : > { %v928_v52 = vmax.f32 %v816_v48, 0.0 }
 0x1e6   : > { %v958_v53 = vpack.c.bf16 %v930_v50, %v929_v49 }
 0x1e7   : > { %v957_v54 = vpack.c.bf16 %v928_v52, %v927_v51  ;;  %v1491_v55 = vpop.f32.mrb[24].mxu1 }
 0x1e8   : > { %v837_v56 = vadd.f32 %v1491_v55, %v1829_v0  ;;  %v828_v57 = vpop.f32.mrb[25].mxu1 }
 0x1e9   : > { %v829_v58 = vadd.f32 %v1829_v0, %v828_v57  ;;  %v1492_v59 = vpop.f32.mrb[26].mxu1  ;;  %1533 = vmatprep.mubr.bf16.mxu0 %v957_v54 }
 0x1ea   : > { %v840_v60 = vadd.f32 %v1492_v59, %v1829_v0  ;;  %v831_v61 = vpop.f32.mrb[27].mxu1  ;;  %1534 = vmatmul.mubr.bf16.gmra.mrb[20].mxu0 %v958_v53  ;;  %v933_v63 = vmax.f32 %v837_v56, 0.0 }
 0x1eb   : > { %v832_v62 = vadd.f32 %v1829_v0, %v831_v61  ;;  %v931_v2 = vmax.f32 %v829_v58, 0.0 }
 0x1ec   : > { %v934_v1 = vmax.f32 %v840_v60, 0.0 }
 0x1ed   : > { %v932_v4 = vmax.f32 %v832_v62, 0.0 }
 0x1ee   : > { %v960_v5 = vpack.c.bf16 %v934_v1, %v933_v63 }
 0x1ef   : > { %v959_v6 = vpack.c.bf16 %v932_v4, %v931_v2  ;;  %v1495_v7 = vpop.f32.mrb[28].mxu1 }
 0x1f0   : > { %v853_v8 = vadd.f32 %v1495_v7, %v1829_v0  ;;  %v844_v9 = vpop.f32.mrb[29].mxu1 }
 0x1f1   : > { %v845_v10 = vadd.f32 %v1829_v0, %v844_v9  ;;  %v1496_v11 = vpop.f32.mrb[30].mxu1  ;;  %1537 = vmatprep.mubr.bf16.mxu0 %v959_v6 }
 0x1f2   : > { %v856_v12 = vadd.f32 %v1496_v11, %v1829_v0  ;;  %v847_v13 = vpop.f32.mrb[31].mxu1  ;;  %1538 = vmatmul.mubr.bf16.gmra.mrb[24].mxu0 %v960_v5  ;;  %v937_v15 = vmax.f32 %v853_v8, 0.0 }
 0x1f3   : > { %v848_v14 = vadd.f32 %v1829_v0, %v847_v13  ;;  %v935_v17 = vmax.f32 %v845_v10, 0.0 }
 0x1f4   : > { %v938_v16 = vmax.f32 %v856_v12, 0.0 }
 0x1f5   : > { %v936_v18 = vmax.f32 %v848_v14, 0.0  ;;  %v1867_v14 = vld [vmem:[%s1947_s6] ss:$0 sm:$0xff] }
 0x1f6   : > { %v962_v19 = vpack.c.bf16 %v938_v16, %v937_v15 }
 0x1f7   : > { %v961_v20 = vpack.c.bf16 %v936_v18, %v935_v17  ;;  %v1499_v21 = vpop.f32.mrb[32].mxu1 }
 0x1f8   : > { %v869_v22 = vadd.f32 %v1499_v21, %v1829_v0  ;;  %v860_v23 = vpop.f32.mrb[33].mxu1 }
 0x1f9   : > { %v861_v24 = vadd.f32 %v1829_v0, %v860_v23  ;;  %v1500_v25 = vpop.f32.mrb[34].mxu1  ;;  %1541 = vmatprep.mubr.bf16.mxu0 %v961_v20 }
 0x1fa   : > { %v872_v38 = vadd.f32 %v1500_v25, %v1829_v0  ;;  %v863_v3 = vpop.f32.mrb[35].mxu1  ;;  %1542 = vmatmul.mubr.bf16.gmra.mrb[28].mxu0 %v962_v19  ;;  %v941_v27 = vmax.f32 %v869_v22, 0.0 }
 0x1fb   : > { %v864_v26 = vadd.f32 %v1829_v0, %v863_v3  ;;  %v939_v29 = vmax.f32 %v861_v24, 0.0 }
 0x1fc   : > { %v942_v28 = vmax.f32 %v872_v38, 0.0 }
 0x1fd   : > { %v940_v30 = vmax.f32 %v864_v26, 0.0 }
 0x1fe   : > { %v964_v31 = vpack.c.bf16 %v942_v28, %v941_v27 }
 0x1ff   : > { %v963_v32 = vpack.c.bf16 %v940_v30, %v939_v29  ;;  %v1503_v33 = vpop.f32.mrb[36].mxu1 }
 0x200   : > { %v885_v34 = vadd.f32 %v1503_v33, %v1829_v0  ;;  %v876_v35 = vpop.f32.mrb[37].mxu1 }
 0x201   : > { %v877_v36 = vadd.f32 %v1829_v0, %v876_v35  ;;  %v1504_v37 = vpop.f32.mrb[38].mxu1  ;;  %1545 = vmatprep.mubr.bf16.mxu0 %v963_v32 }
 0x202   : > { %v888_v39 = vadd.f32 %v1504_v37, %v1829_v0  ;;  %v879_v40 = vpop.f32.mrb[39].mxu1  ;;  %1546 = vmatmul.mubr.bf16.gmra.mrb[32].mxu0 %v964_v31  ;;  %v945_v42 = vmax.f32 %v885_v34, 0.0 }
 0x203   : > { %v880_v41 = vadd.f32 %v1829_v0, %v879_v40  ;;  %v943_v44 = vmax.f32 %v877_v36, 0.0 }
 0x204   : > { %v946_v43 = vmax.f32 %v888_v39, 0.0 }
 0x205   : > { %v944_v45 = vmax.f32 %v880_v41, 0.0 }
 0x206   : > { %v966_v46 = vpack.c.bf16 %v946_v43, %v945_v42 }
 0x207   : > { %v965_v47 = vpack.c.bf16 %v944_v45, %v943_v44  ;;  %v1507_v48 = vpop.f32.mrb[40].mxu1 }
 0x208   : > { %v901_v49 = vadd.f32 %v1507_v48, %v1829_v0  ;;  %v892_v50 = vpop.f32.mrb[41].mxu1 }
 0x209   : > { %v893_v51 = vadd.f32 %v1829_v0, %v892_v50  ;;  %v1508_v52 = vpop.f32.mrb[42].mxu1  ;;  %1549 = vmatprep.mubr.bf16.mxu0 %v965_v47 }
 0x20a   : > { %v904_v53 = vadd.f32 %v1508_v52, %v1829_v0  ;;  %v895_v54 = vpop.f32.mrb[43].mxu1  ;;  %1550 = vmatmul.mubr.bf16.gmra.mrb[36].mxu0 %v966_v46  ;;  %v949_v56 = vmax.f32 %v901_v49, 0.0 }
 0x20b   : > { %v896_v55 = vadd.f32 %v1829_v0, %v895_v54  ;;  %v947_v58 = vmax.f32 %v893_v51, 0.0 }
 0x20c   : > { %v950_v57 = vmax.f32 %v904_v53, 0.0 }
 0x20d   : > { %v948_v59 = vmax.f32 %v896_v55, 0.0 }
 0x20e   : > { %v968_v60 = vpack.c.bf16 %v950_v57, %v949_v56 }
 0x20f   : > { %v967_v61 = vpack.c.bf16 %v948_v59, %v947_v58  ;;  %v1511_v62 = vpop.f32.mrb[44].mxu1 }
 0x210   : > { %v917_v63 = vadd.f32 %v1511_v62, %v1829_v0  ;;  %v908_v1 = vpop.f32.mrb[45].mxu1 }
 0x211   : > { %v909_v2 = vadd.f32 %v1829_v0, %v908_v1  ;;  %v1512_v4 = vpop.f32.mrb[46].mxu1  ;;  %1553 = vmatprep.mubr.bf16.mxu0 %v967_v61 }
 0x212   : > { %v920_v5 = vadd.f32 %v1512_v4, %v1829_v0  ;;  %v911_v6 = vpop.f32.mrb[47].mxu1  ;;  %1554 = vmatmul.mubr.bf16.gmra.mrb[40].mxu0 %v968_v60  ;;  %v953_v8 = vmax.f32 %v917_v63, 0.0 }
 0x213   : > { %v912_v7 = vadd.f32 %v1829_v0, %v911_v6  ;;  %v951_v10 = vmax.f32 %v909_v2, 0.0 }
 0x214   : > { %v954_v9 = vmax.f32 %v920_v5, 0.0 }
 0x215   : > { %v952_v11 = vmax.f32 %v912_v7, 0.0 }
 0x216   : > { %v970_v12 = vpack.c.bf16 %v954_v9, %v953_v8 }
 0x217   : > { %v969_v13 = vpack.c.bf16 %v952_v11, %v951_v10 }
 0x219   : > { %1557 = vmatprep.mubr.bf16.mxu0 %v969_v13 }
 0x21a   : > { %1558 = vmatmul.mubr.bf16.gmra.mrb[44].mxu0 %v970_v12 }
 0x2b5   : > { %v1531_v0 = vpop.f32.mrb[16].mxu0 }
 0x2b6   : > { %v1085_v15 = vadd.f32 %v1531_v0, %v1867_v14  ;;  %v1076_v16 = vpop.f32.mrb[17].mxu0 }
 0x2b7   : > { %v1077_v17 = vadd.f32 %v1867_v14, %v1076_v16  ;;  %v1532_v18 = vpop.f32.mrb[18].mxu0 }
 0x2b8   : > { %1205 = vst [vmem:[%s1872_s23 + $0x10] sm:$0xff] %v1085_v15  ;;  %v1088_v19 = vadd.f32 %v1532_v18, %v1867_v14  ;;  %v1079_v20 = vpop.f32.mrb[19].mxu0 }
 0x2b9   : > { %1203 = vst [vmem:[%s1872_s23] sm:$0xff] %v1077_v17  ;;  %v1080_v21 = vadd.f32 %v1867_v14, %v1079_v20 }
 0x2ba   : > { %1206 = vst [vmem:[%s1872_s23 + $0x18] sm:$0xff] %v1088_v19 }
 0x2bb   : > { %1204 = vst [vmem:[%s1872_s23 + $0x8] sm:$0xff] %v1080_v21 }
 0x2bd   : > { %v1535_v22 = vpop.f32.mrb[20].mxu0 }
 0x2be   : > { %v1101_v23 = vadd.f32 %v1535_v22, %v1867_v14  ;;  %v1092_v24 = vpop.f32.mrb[21].mxu0 }
 0x2bf   : > { %v1093_v25 = vadd.f32 %v1867_v14, %v1092_v24  ;;  %v1536_v38 = vpop.f32.mrb[22].mxu0 }
 0x2c0   : > { %1209 = vst [vmem:[%s1872_s23 + $0x30] sm:$0xff] %v1101_v23  ;;  %v1104_v3 = vadd.f32 %v1536_v38, %v1867_v14  ;;  %v1095_v26 = vpop.f32.mrb[23].mxu0 }
 0x2c1   : > { %1207 = vst [vmem:[%s1872_s23 + $0x20] sm:$0xff] %v1093_v25  ;;  %v1096_v27 = vadd.f32 %v1867_v14, %v1095_v26 }
 0x2c2   : > { %1210 = vst [vmem:[%s1872_s23 + $0x38] sm:$0xff] %v1104_v3 }
 0x2c3   : > { %1208 = vst [vmem:[%s1872_s23 + $0x28] sm:$0xff] %v1096_v27 }
 0x2c5   : > { %v1539_v28 = vpop.f32.mrb[24].mxu0 }
 0x2c6   : > { %v1117_v29 = vadd.f32 %v1539_v28, %v1867_v14  ;;  %v1108_v30 = vpop.f32.mrb[25].mxu0 }
 0x2c7   : > { %v1109_v31 = vadd.f32 %v1867_v14, %v1108_v30  ;;  %v1540_v32 = vpop.f32.mrb[26].mxu0 }
 0x2c8   : > { %1213 = vst [vmem:[%s1872_s23 + $0x50] sm:$0xff] %v1117_v29  ;;  %v1120_v33 = vadd.f32 %v1540_v32, %v1867_v14  ;;  %v1111_v34 = vpop.f32.mrb[27].mxu0 }
 0x2c9   : > { %1211 = vst [vmem:[%s1872_s23 + $0x40] sm:$0xff] %v1109_v31  ;;  %v1112_v35 = vadd.f32 %v1867_v14, %v1111_v34 }
 0x2ca   : > { %1214 = vst [vmem:[%s1872_s23 + $0x58] sm:$0xff] %v1120_v33 }
 0x2cb   : > { %1212 = vst [vmem:[%s1872_s23 + $0x48] sm:$0xff] %v1112_v35 }
 0x2cd   : > { %v1543_v36 = vpop.f32.mrb[28].mxu0 }
 0x2ce   : > { %v1133_v37 = vadd.f32 %v1543_v36, %v1867_v14  ;;  %v1124_v39 = vpop.f32.mrb[29].mxu0 }
 0x2cf   : > { %v1125_v40 = vadd.f32 %v1867_v14, %v1124_v39  ;;  %v1544_v41 = vpop.f32.mrb[30].mxu0 }
 0x2d0   : > { %1217 = vst [vmem:[%s1872_s23 + $0x70] sm:$0xff] %v1133_v37  ;;  %v1136_v42 = vadd.f32 %v1544_v41, %v1867_v14  ;;  %v1127_v43 = vpop.f32.mrb[31].mxu0 }
 0x2d1   : > { %1215 = vst [vmem:[%s1872_s23 + $0x60] sm:$0xff] %v1125_v40  ;;  %v1128_v44 = vadd.f32 %v1867_v14, %v1127_v43 }
 0x2d2   : > { %1218 = vst [vmem:[%s1872_s23 + $0x78] sm:$0xff] %v1136_v42 }
 0x2d3   : > { %1216 = vst [vmem:[%s1872_s23 + $0x68] sm:$0xff] %v1128_v44 }
 0x2d5   : > { %v1547_v45 = vpop.f32.mrb[32].mxu0 }
 0x2d6   : > { %v1149_v46 = vadd.f32 %v1547_v45, %v1867_v14  ;;  %v1140_v47 = vpop.f32.mrb[33].mxu0 }
 0x2d7   : > { %v1141_v48 = vadd.f32 %v1867_v14, %v1140_v47  ;;  %v1548_v49 = vpop.f32.mrb[34].mxu0 }
 0x2d8   : > { %1221 = vst [vmem:[%s1872_s23 + $0x90] sm:$0xff] %v1149_v46  ;;  %v1152_v50 = vadd.f32 %v1548_v49, %v1867_v14  ;;  %v1143_v51 = vpop.f32.mrb[35].mxu0 }
 0x2d9   : > { %1219 = vst [vmem:[%s1872_s23 + $0x80] sm:$0xff] %v1141_v48  ;;  %v1144_v52 = vadd.f32 %v1867_v14, %v1143_v51 }
 0x2da   : > { %1222 = vst [vmem:[%s1872_s23 + $0x98] sm:$0xff] %v1152_v50 }
 0x2db   : > { %1220 = vst [vmem:[%s1872_s23 + $0x88] sm:$0xff] %v1144_v52 }
 0x2dd   : > { %v1551_v53 = vpop.f32.mrb[36].mxu0 }
 0x2de   : > { %v1165_v54 = vadd.f32 %v1551_v53, %v1867_v14  ;;  %v1156_v55 = vpop.f32.mrb[37].mxu0 }
 0x2df   : > { %v1157_v56 = vadd.f32 %v1867_v14, %v1156_v55  ;;  %v1552_v57 = vpop.f32.mrb[38].mxu0 }
 0x2e0   : > { %1225 = vst [vmem:[%s1872_s23 + $0xb0] sm:$0xff] %v1165_v54  ;;  %v1168_v58 = vadd.f32 %v1552_v57, %v1867_v14  ;;  %v1159_v59 = vpop.f32.mrb[39].mxu0 }
 0x2e1   : > { %1223 = vst [vmem:[%s1872_s23 + $0xa0] sm:$0xff] %v1157_v56  ;;  %v1160_v60 = vadd.f32 %v1867_v14, %v1159_v59 }
 0x2e2   : > { %1226 = vst [vmem:[%s1872_s23 + $0xb8] sm:$0xff] %v1168_v58 }
 0x2e3   : > { %1224 = vst [vmem:[%s1872_s23 + $0xa8] sm:$0xff] %v1160_v60 }
 0x2e5   : > { %v1555_v61 = vpop.f32.mrb[40].mxu0 }
 0x2e6   : > { %v1181_v62 = vadd.f32 %v1555_v61, %v1867_v14  ;;  %v1172_v63 = vpop.f32.mrb[41].mxu0 }
 0x2e7   : > { %v1173_v1 = vadd.f32 %v1867_v14, %v1172_v63  ;;  %v1556_v2 = vpop.f32.mrb[42].mxu0 }
 0x2e8   : > { %1229 = vst [vmem:[%s1872_s23 + $0xd0] sm:$0xff] %v1181_v62  ;;  %v1184_v4 = vadd.f32 %v1556_v2, %v1867_v14  ;;  %v1175_v5 = vpop.f32.mrb[43].mxu0 }
 0x2e9   : > { %1227 = vst [vmem:[%s1872_s23 + $0xc0] sm:$0xff] %v1173_v1  ;;  %v1176_v6 = vadd.f32 %v1867_v14, %v1175_v5 }
 0x2ea   : > { %1230 = vst [vmem:[%s1872_s23 + $0xd8] sm:$0xff] %v1184_v4 }
 0x2eb   : > { %1228 = vst [vmem:[%s1872_s23 + $0xc8] sm:$0xff] %v1176_v6 }
 0x2ed   : > { %v1559_v7 = vpop.f32.mrb[44].mxu0 }
 0x2ee   : > { %v1197_v8 = vadd.f32 %v1559_v7, %v1867_v14  ;;  %v1188_v9 = vpop.f32.mrb[45].mxu0 }
 0x2ef   : > { %v1189_v10 = vadd.f32 %v1867_v14, %v1188_v9  ;;  %v1560_v11 = vpop.f32.mrb[46].mxu0 }
 0x2f0   : > { %1233 = vst [vmem:[%s1872_s23 + $0xf0] sm:$0xff] %v1197_v8  ;;  %v1200_v12 = vadd.f32 %v1560_v11, %v1867_v14  ;;  %v1191_v13 = vpop.f32.mrb[47].mxu0 }
 0x2f1   : > { %1231 = vst [vmem:[%s1872_s23 + $0xe0] sm:$0xff] %v1189_v10  ;;  %v1192_v0 = vadd.f32 %v1867_v14, %v1191_v13 }
 0x2f2   : > { %1234 = vst [vmem:[%s1872_s23 + $0xf8] sm:$0xff] %v1200_v12 }
 0x2f3   : > { %1232 = vst [vmem:[%s1872_s23 + $0xe8] sm:$0xff] %v1192_v0 }
 0x2f4 PF: > { %s17_s24 = sadd.s32 1, %s1631_s24  }
 0x2f5   : > { %p14_p4 = scmp.ge.s32.totalorder %s17_s24, 4  }
 0x2f7   :  { %16 = sbr.rel (!%p14_p4) target bundleno = 1 (0x1), region = 78 }

</bundles_post_ra>
